<compile_context>
chip_gen: v7x
topology: tpu7x:2x2x1
jax: 0.10.0
libtpu: 0.0.40
codegen_flags: <defaults>
</compile_context>

<pallas_src>
import jax
import jax.numpy as jnp
from jax.experimental import pallas as pl
from jax.experimental.pallas import tpu as pltpu


def _cdiv(a, b):
    return -(-a // b)


def _round_up(x, m):
    return _cdiv(x, m) * m


def _vmem_capacity_bytes():
    try:
        return int(pltpu.get_tpu_info().vmem_capacity_bytes)
    except Exception:
        return 64 << 20  # conservative (v7x-sized); safe on every generation


def _choose_pack_k(T, Cp1):
    """Largest lane-packing factor k that DIVIDES T (so the reshape is free /
    no HBM copy) while maximizing VMEM lane efficiency kC / round_up(kC, 128)."""
    best_k = 1
    best_eff = Cp1 / _round_up(Cp1, 128)
    k_max = max(1, min(T, 1024 // max(1, Cp1)))
    for k in range(2, k_max + 1):
        if T % k:
            continue
        kC = k * Cp1
        eff = kC / _round_up(kC, 128)
        if eff > best_eff + 1e-9:
            best_k, best_eff = k, eff
    return best_k


def _choose_tile_b(B):
    # Split the batch only when it divides cleanly into sublane-aligned chunks.
    if B >= 16 and B % 8 == 0:
        return 8
    return B


def _make_ace_sum_kernel(tiles_per_split, tile_t, rows, need_mask):
    """Streaming per-(batch, packed-class) sum over the time axis.

    Grid: (split [parallel], batch tile [parallel], time tile [arbitrary]).
    preds_ref: (tile_b, tile_t, kC) block of packed predictions
    sums_ref : (1, tile_b, kC) f32 partial-sum block, resident across time tiles
    """

    def kernel(preds_ref, sums_ref):
        t = pl.program_id(2)

        @pl.when(t == 0)
        def _init():
            sums_ref[...] = jnp.zeros_like(sums_ref)

        x = preds_ref[...].astype(jnp.float32)
        if need_mask:
            # Last (possibly partial / phantom) blocks: zero the invalid rows.
            # Mandatory for correctness: the overhang is unspecified memory.
            s = pl.program_id(0)
            gtb = s * tiles_per_split + t                 # global time-block id
            n_valid = jnp.clip(rows - gtb * tile_t, 0, tile_t)
            ridx = jax.lax.broadcasted_iota(jnp.int32, x.shape, 1)
            x = jnp.where(ridx < n_valid, x, jnp.float32(0.0))
        sums_ref[...] += jnp.sum(x, axis=1)[None]

    return kernel


def ace_loss(preds, labels, target_block_bytes=None):
    """preds: (B, T, C+1) or (B, H, W, C+1); labels: (B, C+1). Returns scalar loss.

    target_block_bytes (optional): desired VMEM bytes per (double-buffered) input
    block; clamped to the per-chip VMEM budget.
    """
    if preds.ndim == 4:
        B, H, W, Cp1 = preds.shape
        T = H * W
        preds = preds.reshape(B, T, Cp1)          # pure reshape, no copy
    else:
        B, T, Cp1 = preds.shape

    itemsize = jnp.dtype(preds.dtype).itemsize
    sub_mult = 8 * max(1, 4 // itemsize)          # 8 f32 / 16 bf16 / 32 i8-fp8

    # ---- lane-dense packing with a divisor k => free reshape, zero copies -----
    k = _choose_pack_k(T, Cp1)
    rows = T // k
    kC = k * Cp1
    x = preds.reshape(B, rows, kC)                # pure reshape, no copy
    kC_pad = _round_up(kC, 128)                   # lane padding in VMEM

    tile_b = _choose_tile_b(B)
    n_batch_tiles = B // tile_b

    # ---- per-chip VMEM budgeting ----------------------------------------------
    vmem_cap = _vmem_capacity_bytes()
    budget = int(0.75 * vmem_cap)
    out_vmem = 2 * tile_b * kC_pad * 4            # accumulator block (padded)
    headroom = 2 << 20
    auto_blk = max(1 << 20, min(32 << 20, (budget - out_vmem - headroom) // 2))
    blk_target = auto_blk if target_block_bytes is None else min(
        int(target_block_bytes), auto_blk)

    row_vmem = tile_b * kC_pad * itemsize         # VMEM bytes per packed row
    max_rows = max(sub_mult, blk_target // row_vmem)
    if rows <= max_rows:
        tile_t = rows                             # full dim: always layout-legal
    else:
        tile_t = max(sub_mult, (max_rows // sub_mult) * sub_mult)

    n_time_blocks = _cdiv(rows, tile_t)
    # Use the 2nd TensorCore (v7x) via time-split partial sums when the batch
    # axis cannot provide parallelism; harmless (one extra add) elsewhere.
    n_splits = 1 if n_batch_tiles >= 2 else min(2, n_time_blocks)
    tiles_per_split = _cdiv(n_time_blocks, n_splits)
    has_phantom = n_splits * tiles_per_split != n_time_blocks
    need_mask = (rows % tile_t != 0) or has_phantom

    blk_vmem = tile_b * tile_t * kC_pad * itemsize
    vmem_limit = 2 * blk_vmem + out_vmem + headroom
    vmem_limit = int(min(max(vmem_limit, 16 << 20), 0.9 * vmem_cap))

    if has_phantom:
        # clamp so phantom grid steps re-read the last valid block (then masked)
        def in_map(s, b, t):
            return (b, jnp.minimum(s * tiles_per_split + t, n_time_blocks - 1), 0)
    else:
        def in_map(s, b, t):
            return (b, s * tiles_per_split + t, 0)

    kernel = _make_ace_sum_kernel(tiles_per_split, tile_t, rows, need_mask)

    sums = pl.pallas_call(
        kernel,
        out_shape=jax.ShapeDtypeStruct((n_splits, B, kC), jnp.float32),
        grid_spec=pltpu.PrefetchScalarGridSpec(
            num_scalar_prefetch=0,
            grid=(n_splits, n_batch_tiles, tiles_per_split),
            in_specs=[pl.BlockSpec((tile_b, tile_t, kC), in_map)],
            out_specs=pl.BlockSpec((1, tile_b, kC), lambda s, b, t: (s, b, 0)),
        ),
        compiler_params=pltpu.CompilerParams(
            dimension_semantics=("parallel", "parallel", "arbitrary"),
            vmem_limit_bytes=vmem_limit,
        ),
    )(x)

    # ---- tiny (B, Cp1) epilogue in plain JAX ----------------------------------
    class_sums = sums.reshape(n_splits, B, k, Cp1).sum(axis=(0, 2))   # (B, Cp1)
    T_f = jnp.float32(T)
    p = class_sums / T_f
    lab = labels.astype(jnp.float32)
    lab = lab.at[:, 0].set(T_f - lab[:, 0])                            # blank count
    lab = lab / T_f
    # Guard 0 * log(0) -> NaN (zero class mass with zero label weight); classes
    # with positive label weight keep the reference -inf behaviour.
    terms = jnp.where(lab > 0, lab * jnp.log(p), jnp.float32(0.0))
    return -jnp.sum(terms) / jnp.float32(B)


def ace_loss_ref(preds, labels):
    """Pure-JAX reference mirroring the (fixed) PyTorch forward."""
    B = preds.shape[0]
    if preds.ndim == 4:
        T = preds.shape[1] * preds.shape[2]
    else:
        T = preds.shape[1]
    preds = preds.reshape(B, T, -1).astype(jnp.float32)
    labels = labels.astype(jnp.float32)
    labels = labels.at[:, 0].set(T - labels[:, 0])
    p = jnp.sum(preds, axis=1) / T
    lab = labels / T
    return -jnp.sum(jnp.log(p) * lab) / B


def _make_inputs(key, shape, dtype=jnp.float32):
    k1, k2 = jax.random.split(key)
    logits = jax.random.normal(k1, shape, dtype=jnp.float32)
    preds = jax.nn.softmax(logits, axis=-1).astype(dtype)
    B, Cp1 = shape[0], shape[-1]
    counts = jax.random.randint(k2, (B, Cp1), 0, 3).astype(jnp.float32)
    counts = counts.at[:, 0].set(jnp.sum(counts[:, 1:], axis=1))
    return preds, counts


if __name__ == "__main__":
    key = jax.random.PRNGKey(0)
    ka, kb, kc = jax.random.split(key, 3)

    # --- 2D case: (B, H, W, num_classes+1), single-tile fully packed path ------
    preds2d, labels2d = _make_inputs(ka, (2, 8, 8, 32))
    loss = jax.block_until_ready(ace_loss(preds2d, labels2d))
    loss_ref = jax.block_until_ready(ace_loss_ref(preds2d, labels2d))
    assert jnp.isfinite(loss), "2D loss is not finite"
    assert jnp.allclose(loss, loss_ref, rtol=1e-5, atol=1e-5), (loss, loss_ref)

    # --- 1D case, small blocks: multi-tile + time-split + ragged-tile mask -----
    preds1d, labels1d = _make_inputs(kb, (2, 1000, 37))
    loss1 = jax.block_until_ready(
        ace_loss(preds1d, labels1d, target_block_bytes=64 << 10))
    loss1_ref = jax.block_until_ready(ace_loss_ref(preds1d, labels1d))
    assert jnp.isfinite(loss1), "1D loss is not finite"
    assert jnp.allclose(loss1, loss1_ref, rtol=1e-5, atol=1e-5), (loss1, loss1_ref)

    # --- bf16 streaming path (16-row sublane alignment, f32 accumulation) ------
    preds_bf, labels_bf = _make_inputs(kc, (2, 1000, 37), dtype=jnp.bfloat16)
    loss2 = jax.block_until_ready(
        ace_loss(preds_bf, labels_bf, target_block_bytes=64 << 10))
    loss2_ref = jax.block_until_ready(ace_loss_ref(preds_bf, labels_bf))
    assert jnp.isfinite(loss2), "bf16 loss is not finite"
    assert jnp.allclose(loss2, loss2_ref, rtol=1e-4, atol=1e-4), (loss2, loss2_ref)

    print("KERNEL_OK")
</pallas_src>

<mosaic_0001>
module attributes {stable_mosaic.version = 11 : i64} {
  func.func @kernel(%arg0: i32, %arg1: i32, %arg2: i32, %arg3: memref<2x16x128xf32, #tpu.memory_space<vmem>>, %arg4: memref<1x2x128xf32, #tpu.memory_space<vmem>>) attributes {dimension_semantics = [#tpu.dimension_semantics<parallel>, #tpu.dimension_semantics<parallel>, #tpu.dimension_semantics<arbitrary>], iteration_bounds = array<i64: 1, 1, 1>, scalar_prefetch = 0 : i64, scratch_operands = 0 : i64, tpu.core_type = #tpu.core_type<tc>, window_params = [{transform_indices = @transform_0, window_bounds = array<i64: 2, 16, 128>}, {transform_indices = @transform_1, window_bounds = array<i64: 1, 2, 128>}]} {
    %c0_i32 = arith.constant 0 : i32
    %0 = arith.cmpi eq, %arg2, %c0_i32 : i32
    %1 = arith.extui %0 : i1 to i32
    %c0_i32_0 = arith.constant 0 : i32
    %2 = arith.cmpi ne, %1, %c0_i32_0 : i32
    scf.if %2 {
      %cst_9 = arith.constant 0.000000e+00 : f32
      %9 = vector.broadcast %cst_9 : f32 to vector<1x2x128xf32>
      %c0_10 = arith.constant 0 : index
      %c0_11 = arith.constant 0 : index
      %c0_12 = arith.constant 0 : index
      %10 = vector.load %arg4[%c0_10, %c0_11, %c0_12] : memref<1x2x128xf32, #tpu.memory_space<vmem>>, vector<1x2x128xf32>
      tpu.vector_store %arg4[%c0_10, %c0_11, %c0_12], %9 {strides = array<i32>} : memref<1x2x128xf32, #tpu.memory_space<vmem>>, vector<1x2x128xf32>,
    } else {
    }
    %c0 = arith.constant 0 : index
    %c0_1 = arith.constant 0 : index
    %c0_2 = arith.constant 0 : index
    %3 = vector.load %arg3[%c0, %c0_1, %c0_2] : memref<2x16x128xf32, #tpu.memory_space<vmem>>, vector<2x16x128xf32>
    %c0_3 = arith.constant 0 : index
    %c0_4 = arith.constant 0 : index
    %c0_5 = arith.constant 0 : index
    %4 = vector.load %arg4[%c0_3, %c0_4, %c0_5] : memref<1x2x128xf32, #tpu.memory_space<vmem>>, vector<1x2x128xf32>
    %cst = arith.constant dense<0.000000e+00> : vector<2x128xf32>
    %5 = vector.multi_reduction <add>, %3, %cst [1] : vector<2x16x128xf32> to vector<2x128xf32>
    %6 = vector.shape_cast %5 : vector<2x128xf32> to vector<1x2x128xf32>
    %7 = arith.addf %4, %6 : vector<1x2x128xf32>
    %c0_6 = arith.constant 0 : index
    %c0_7 = arith.constant 0 : index
    %c0_8 = arith.constant 0 : index
    %8 = vector.load %arg4[%c0_6, %c0_7, %c0_8] : memref<1x2x128xf32, #tpu.memory_space<vmem>>, vector<1x2x128xf32>
    tpu.vector_store %arg4[%c0_6, %c0_7, %c0_8], %7 {strides = array<i32>} : memref<1x2x128xf32, #tpu.memory_space<vmem>>, vector<1x2x128xf32>,
    return
  }
  func.func @transform_0(%arg0: i32, %arg1: i32, %arg2: i32) -> (i32, i32, i32) {
    %c1_i32 = arith.constant 1 : i32
    %0 = arith.muli %arg0, %c1_i32 : i32
    %1 = arith.addi %0, %arg2 : i32
    %c0_i32 = arith.constant 0 : i32
    %c0_i32_0 = arith.constant 0 : i32
    return %arg1, %1, %c0_i32 : i32, i32, i32
  }
  func.func @transform_1(%arg0: i32, %arg1: i32, %arg2: i32) -> (i32, i32, i32) {
    %c0_i32 = arith.constant 0 : i32
    %c0_i32_0 = arith.constant 0 : i32
    return %arg0, %arg1, %c0_i32 : i32, i32, i32
  }
}

</mosaic_0001>

<bundles_post_ra>
// kernel: tpu_custom_call.1
= control target key start
LH: loop header
LB: loop body
LE: loop exit
PB: predicated region body
PF: predicated region fallthrough
CT: control target
= control target key end

     0   :  { %6 = vsyncpa [#allocation3], 0  ;;  %s167_s0 = inlined_call_operand.hbm [shape: f32[2,16,128], index: 0, kind: input, shape index: {}]   ;;  %s168_s1 = inlined_call_operand.hbm [shape: f32[1,2,128], index: 1, kind: output, shape index: {}]  }
   0x1   :  { %7 = vsyncpa [#allocation4], 0  ;;  %s128_s6 = smov [#allocation2]   ;;  %s80_s10 = scalar_lea.hbm %s167_s0, 512 }
   0x2   :  { %s17_s7 = sshll.u32 %s128_s6, 4  ;;  %p81_p0 = scmp.ne.s32.totalorder %s167_s0, %s80_s10  ;;  %s18_s7 = int_to_ptr.vmem [resolvable:$true] %s17_s7 }
   0x3   :  { %p84_p1 = scmp.lt.u32.totalorder %s80_s10, %s167_s0 }
   0x5   :  { %p86_p2 = pnand %p84_p1, %p81_p0 }
   0x7   :  { %89 = shalt.err (!%p86_p2)
}
   0x8   :  { %s90_s15 = scalar_lea.vmem %s18_s7, 512  ;;  %p95_p4 = scmp.lt.s32.totalorder %s18_s7, %s18_s7 }
   0x9   :  { %p91_p3 = scmp.ne.s32.totalorder %s18_s7, %s90_s15  ;;  %p96_p5 = scmp.lt.s32.totalorder %s90_s15, %s90_s15 }
   0xb   :  { %p97_p6 = por %p96_p5, %p95_p4 }
   0xd   :  { %p98_p7 = pnand %p97_p6, %p91_p3 }
   0xf   :  { %101 = shalt.err (!%p98_p7)
}
  0x10   :  { %s129_s16 = smov 128   ;;  %s130_s17 = smov 8  }
  0x11   :  { %23 = dma.hbm_to_vmem [thread:$0]  %s167_s0, 512, %s18_s7, [#allocation3], %s129_s16, %s129_s16, %s130_s17  }
  0x12   :  { %124 = dma.done.wait [#allocation3], 512  }
  0x13   :  { %125 = vsyncadd [#allocation3], 4294966784  ;;  %v131_v0 = vmov 0.0   ;;  %v34_v1 = vld [vmem:[#allocation2] sm:$0xff]  ;;  %v35_v2 = vld [vmem:[#allocation2 + $0x8] sm:$0xff]  ;;  %vm55_vm0 = vcmask 1041409  }
  0x14   :  { %33 = vst [vmem:[#allocation5] sm:$0x3] %v131_v0  ;;  %v36_v3 = vld [vmem:[#allocation2 + $0x10] sm:$0xff]  ;;  %v37_v4 = vld [vmem:[#allocation2 + $0x18] sm:$0xff]  ;;  %v39_v5 = vadd.f32 %v35_v2, %v34_v1  ;;  %s132_s0 = smov [#allocation5]  }
  0x15   :  { %v46_v6 = vadd.f32 %v37_v4, %v36_v3  ;;  %s66_s20 = sshll.u32 %s132_s0, 4  ;;  %s67_s20 = int_to_ptr.vmem [resolvable:$true] %s66_s20 }
  0x16   :  { %v40_v7 = vrot.slane %v39_v5, 4  ;;  %s102_s21 = scalar_lea.vmem %s67_s20, 32  ;;  %p107_p9 = scmp.lt.s32.totalorder %s67_s20, %s67_s20 }
  0x17   :  { %v47_v8 = vrot.slane %v46_v6, 4  ;;  %p103_p8 = scmp.ne.s32.totalorder %s67_s20, %s102_s21  ;;  %p108_p10 = scmp.lt.s32.totalorder %s102_s21, %s102_s21 }
  0x18   :  { %v41_v9 = vadd.f32 %v40_v7, %v39_v5 }
  0x19   :  { %v48_v10 = vadd.f32 %v47_v8, %v46_v6  ;;  %p109_p11 = por %p108_p10, %p107_p9 }
  0x1a   :  { %v42_v11 = vrot.slane %v41_v9, 2 }
  0x1b   :  { %v49_v12 = vrot.slane %v48_v10, 2  ;;  %v38_v18 = vld [vmem:[#allocation5] sm:$0x3]  ;;  %p110_p12 = pnand %p109_p11, %p103_p8 }
  0x1c   :  { %v43_v13 = vadd.f32 %v42_v11, %v41_v9 }
  0x1d   :  { %v50_v14 = vadd.f32 %v49_v12, %v48_v10 }
  0x1e   :  { %v44_v15 = vrot.slane %v43_v13, 1 }
  0x1f   :  { %v51_v16 = vrot.slane %v50_v14, 1 }
  0x20   :  { %v45_v17 = vadd.f32 %v44_v15, %v43_v13 }
  0x21   :  { %v52_v19 = vadd.f32 %v51_v16, %v50_v14 }
  0x23   :  { %v56_v20 = vsel %vm55_vm0, %v52_v19, %v45_v17 }
  0x24   :  { %v58_v21 = vadd.f32 %v56_v20, %v38_v18 }
  0x26   :  { %59 = vst [vmem:[#allocation5] sm:$0x3] %v58_v21 }
  0x27   :  { %113 = shalt.err (!%p110_p12)
}
  0x28   :  { %s114_s24 = scalar_lea.hbm %s168_s1, 32 }
  0x29   :  { %p115_p13 = scmp.ne.s32.totalorder %s168_s1, %s114_s24  ;;  %p118_p0 = scmp.lt.u32.totalorder %s114_s24, %s168_s1 }
  0x2b   :  { %p120_p1 = pnand %p118_p0, %p115_p13 }
  0x2d   :  { %123 = shalt.err (!%p120_p1)
}
  0x2e   :  { %69 = dma.vmem_to_hbm [thread:$0]  %s67_s20, 32, %s168_s1, [#allocation4]  }
  0x2f   :  { %126 = dma.done.wait [#allocation4], 32  }
  0x30   :  { %127 = vsyncadd [#allocation4], 4294967264 }
  0x31   :  { %73 = vsyncpa [#allocation3], 1 }
  0x32   :  { %74 = vsyncpa [#allocation4], 1 }

</bundles_post_ra>
